<compile_context>
chip_gen: v6e
topology: v6e:2x2x1
jax: 0.10.0
libtpu: 0.0.40
codegen_flags: <defaults>
</compile_context>

<pallas_src>
import jax
import jax.numpy as jnp
from jax import lax
from jax.experimental import pallas as pl
from jax.experimental.pallas import tpu as pltpu

P_DROP = 0.25
_KEEP_SCALE = 1.0 / (1.0 - P_DROP)

# Use the EUP approximate reciprocal only when actually running on TPU hardware;
# the generic (CPU interpret) path uses an exact divide.
ON_TPU = jax.default_backend() == "tpu"


def _recip(x):
    if ON_TPU:
        return pl.reciprocal(x, approx=True)   # EUP slot, frees the VALU
    return 1.0 / x


def sdpa_kernel(x1_ref, x2t_ref, x3_ref, u_ref, o_ref):
    # v1 = x1 @ x2^T.  x2 arrives pre-transposed as (D, S), so we contract
    # lhs dim 1 with rhs dim 0 -- no in-kernel transpose needed.
    # Operands are bf16, accumulation is f32 (full MXU rate).
    v1 = lax.dot_general(
        x1_ref[...], x2t_ref[...],
        dimension_numbers=(((1,), (0,)), ((), ())),
        preferred_element_type=jnp.float32,
    )

    x3 = x3_ref[...]                      # f32; reused as divisor and as "V"

    # v2 = v1 / x3   (elementwise)
    v2 = v1 * _recip(x3)

    # v3 = softmax(v2, axis=-1)  -- f32 math
    m = jnp.max(v2, axis=-1, keepdims=True)
    e = jnp.exp(v2 - m)
    v3 = e * _recip(jnp.sum(e, axis=-1, keepdims=True))

    # v4 = dropout(v3, p=0.25): keep with prob 0.75, scale kept values by 1/0.75.
    keep = u_ref[...] >= jnp.float32(P_DROP)
    v4 = jnp.where(keep, v3 * jnp.float32(_KEEP_SCALE), jnp.float32(0.0))

    # v5 = v4 @ x3  -- bf16 MXU operands, f32 accumulation.
    o_ref[...] = jnp.dot(
        v4.astype(jnp.bfloat16), x3.astype(jnp.bfloat16),
        preferred_element_type=jnp.float32,
    )


def model_forward(x1, x2, x3, seed=0):
    """v5 = dropout(softmax((x1 @ x2^T) / x3, -1), p=0.25) @ x3.

    Accepts 2-D inputs like the PyTorch module ((S,D),(S,D),(S,S)) or a leading
    batch axis ((B,S,D),(B,S,D),(B,S,S)); the batch axis is the Pallas grid.
    """
    squeeze = (x1.ndim == 2)
    if squeeze:
        x1, x2, x3 = x1[None], x2[None], x3[None]
    B, S, D = x1.shape
    assert x2.shape == (B, S, D)
    assert x3.shape == (B, S, S)

    # Layout plumbing outside the kernel: pre-transpose x2 -> (B, D, S) so the
    # first matmul needs no XLU transpose, and narrow the pure-matmul operands
    # to bf16 (halves their DMA bytes; full MXU rate). x3 stays f32 (divisor).
    x1b = x1.astype(jnp.bfloat16)
    x2t = jnp.swapaxes(x2, -1, -2).astype(jnp.bfloat16)
    x3f = x3.astype(jnp.float32)

    # Dropout randomness: host-side counter-based PRNG, one uniform per score
    # element; independent across batch/grid tiles by construction.
    # TODO(synk): on real TPU, pltpu.prng_seed/prng_random_bits could generate
    # this mask in-kernel (saving the B*S*S f32 HBM read); kept host-side so the
    # kernel also lowers under CPU interpret mode.
    u = jax.random.uniform(jax.random.PRNGKey(seed), (B, S, S), dtype=jnp.float32)

    cost = pl.CostEstimate(
        flops=2 * B * S * S * D + 2 * B * S * S * S,
        transcendentals=B * S * S,                       # exp in softmax
        bytes_accessed=(x1b.size * 2 + x2t.size * 2 + x3f.size * 4
                        + u.size * 4 + B * S * S * 4),
    )

    extra = {}
    if ON_TPU:
        extra["compiler_params"] = pltpu.CompilerParams(
            dimension_semantics=("parallel",))

    out = pl.pallas_call(
        sdpa_kernel,
        out_shape=jax.ShapeDtypeStruct((B, S, S), jnp.float32),
        grid=(B,),
        in_specs=[
            pl.BlockSpec((None, S, D), lambda b: (b, 0, 0)),   # x1  (bf16)
            pl.BlockSpec((None, D, S), lambda b: (b, 0, 0)),   # x2^T (bf16)
            pl.BlockSpec((None, S, S), lambda b: (b, 0, 0)),   # x3  (f32)
            pl.BlockSpec((None, S, S), lambda b: (b, 0, 0)),   # dropout uniforms
        ],
        out_specs=pl.BlockSpec((None, S, S), lambda b: (b, 0, 0)),
        cost_estimate=cost,
        **extra,
    )(x1b, x2t, x3f, u)

    return out[0] if squeeze else out


if __name__ == "__main__":
    # Small deterministic test shapes: batch=2, seq=8, hidden=32.
    B, S, D = 2, 8, 32
    key = jax.random.PRNGKey(0)
    k1, k2, k3 = jax.random.split(key, 3)
    x1 = jax.random.normal(k1, (B, S, D), dtype=jnp.float32)
    x2 = jax.random.normal(k2, (B, S, D), dtype=jnp.float32)
    # keep the divisor away from zero so the elementwise div stays finite
    x3 = jax.random.uniform(k3, (B, S, S), dtype=jnp.float32, minval=0.5, maxval=1.5)

    out = model_forward(x1, x2, x3, seed=0)
    out = jax.block_until_ready(out)
    assert out.shape == (B, S, S)
    assert bool(jnp.isfinite(out).all())
    print("KERNEL_OK")
</pallas_src>

<mosaic_0001>
module attributes {stable_mosaic.version = 11 : i64} {
  func.func @sdpa_kernel(%arg0: i32, %arg1: memref<1x8x32xbf16, #tpu.memory_space<vmem>>, %arg2: memref<1x32x8xbf16, #tpu.memory_space<vmem>>, %arg3: memref<1x8x8xf32, #tpu.memory_space<vmem>>, %arg4: memref<1x8x8xf32, #tpu.memory_space<vmem>>, %arg5: memref<1x8x8xf32, #tpu.memory_space<vmem>>) attributes {dimension_semantics = [#tpu.dimension_semantics<arbitrary>], iteration_bounds = array<i64: 2>, scalar_prefetch = 0 : i64, scratch_operands = 0 : i64, tpu.core_type = #tpu.core_type<tc>, window_params = [{transform_indices = @transform_0, window_bounds = array<i64: 1, 8, 32>}, {transform_indices = @transform_1, window_bounds = array<i64: 1, 32, 8>}, {transform_indices = @transform_2, window_bounds = array<i64: 1, 8, 8>}, {transform_indices = @transform_3, window_bounds = array<i64: 1, 8, 8>}, {transform_indices = @transform_4, window_bounds = array<i64: 1, 8, 8>}]} {
    %c0 = arith.constant 0 : index
    %c0_0 = arith.constant 0 : index
    %c0_1 = arith.constant 0 : index
    %0 = vector.load %arg1[%c0, %c0_0, %c0_1] : memref<1x8x32xbf16, #tpu.memory_space<vmem>>, vector<1x8x32xbf16>
    %1 = vector.shape_cast %0 : vector<1x8x32xbf16> to vector<8x32xbf16>
    %c0_2 = arith.constant 0 : index
    %c0_3 = arith.constant 0 : index
    %c0_4 = arith.constant 0 : index
    %2 = vector.load %arg2[%c0_2, %c0_3, %c0_4] : memref<1x32x8xbf16, #tpu.memory_space<vmem>>, vector<1x32x8xbf16>
    %3 = vector.shape_cast %2 : vector<1x32x8xbf16> to vector<32x8xbf16>
    %cst = arith.constant dense<0.000000e+00> : vector<8x8xf32>
    %4 = tpu.matmul %1, %3, %cst {dimension_numbers = #tpu.dot_dimension_numbers<[1], [0], [0], [1], [0, 0, 1, 1], [], []>} : vector<8x32xbf16>, vector<32x8xbf16>, vector<8x8xf32> -> vector<8x8xf32>
    %c0_5 = arith.constant 0 : index
    %c0_6 = arith.constant 0 : index
    %c0_7 = arith.constant 0 : index
    %5 = vector.load %arg3[%c0_5, %c0_6, %c0_7] : memref<1x8x8xf32, #tpu.memory_space<vmem>>, vector<1x8x8xf32>
    %6 = vector.shape_cast %5 : vector<1x8x8xf32> to vector<8x8xf32>
    %cst_8 = arith.constant 1.000000e+00 : f32
    %7 = vector.broadcast %cst_8 : f32 to vector<8x8xf32>
    %8 = arith.divf %7, %6 : vector<8x8xf32>
    %9 = arith.mulf %4, %8 : vector<8x8xf32>
    %cst_9 = arith.constant dense<0xFF800000> : vector<8xf32>
    %10 = vector.multi_reduction <maximumf>, %9, %cst_9 [1] : vector<8x8xf32> to vector<8xf32>
    %11 = vector.shape_cast %10 : vector<8xf32> to vector<8x1xf32>
    %12 = vector.broadcast %11 : vector<8x1xf32> to vector<8x8xf32>
    %13 = arith.subf %9, %12 : vector<8x8xf32>
    %14 = math.exp %13 : vector<8x8xf32>
    %cst_10 = arith.constant dense<0.000000e+00> : vector<8xf32>
    %15 = vector.multi_reduction <add>, %14, %cst_10 [1] : vector<8x8xf32> to vector<8xf32>
    %16 = vector.shape_cast %15 : vector<8xf32> to vector<8x1xf32>
    %cst_11 = arith.constant 1.000000e+00 : f32
    %17 = vector.broadcast %cst_11 : f32 to vector<8x1xf32>
    %18 = arith.divf %17, %16 : vector<8x1xf32>
    %19 = vector.broadcast %18 : vector<8x1xf32> to vector<8x8xf32>
    %20 = arith.mulf %14, %19 : vector<8x8xf32>
    %c0_12 = arith.constant 0 : index
    %c0_13 = arith.constant 0 : index
    %c0_14 = arith.constant 0 : index
    %21 = vector.load %arg4[%c0_12, %c0_13, %c0_14] : memref<1x8x8xf32, #tpu.memory_space<vmem>>, vector<1x8x8xf32>
    %22 = vector.shape_cast %21 : vector<1x8x8xf32> to vector<8x8xf32>
    %cst_15 = arith.constant 2.500000e-01 : f32
    %23 = vector.broadcast %cst_15 : f32 to vector<8x8xf32>
    %24 = arith.cmpf oge, %22, %23 : vector<8x8xf32>
    %cst_16 = arith.constant 1.33333337 : f32
    %25 = vector.broadcast %cst_16 : f32 to vector<8x8xf32>
    %26 = arith.mulf %20, %25 : vector<8x8xf32>
    %cst_17 = arith.constant 0.000000e+00 : f32
    %27 = vector.broadcast %cst_17 : f32 to vector<8x8xf32>
    %28 = arith.select %24, %26, %27 : vector<8x8xi1>, vector<8x8xf32>
    %29 = arith.truncf %28 : vector<8x8xf32> to vector<8x8xbf16>
    %30 = arith.truncf %6 : vector<8x8xf32> to vector<8x8xbf16>
    %cst_18 = arith.constant dense<0.000000e+00> : vector<8x8xf32>
    %31 = tpu.matmul %29, %30, %cst_18 {dimension_numbers = #tpu.dot_dimension_numbers<[1], [0], [0], [1], [0, 0, 1, 1], [], []>} : vector<8x8xbf16>, vector<8x8xbf16>, vector<8x8xf32> -> vector<8x8xf32>
    %c0_19 = arith.constant 0 : index
    %c0_20 = arith.constant 0 : index
    %c0_21 = arith.constant 0 : index
    %32 = vector.load %arg5[%c0_19, %c0_20, %c0_21] : memref<1x8x8xf32, #tpu.memory_space<vmem>>, vector<1x8x8xf32>
    %33 = vector.shape_cast %32 : vector<1x8x8xf32> to vector<8x8xf32>
    %34 = vector.shape_cast %31 : vector<8x8xf32> to vector<1x8x8xf32>
    tpu.vector_store %arg5[%c0_19, %c0_20, %c0_21], %34 {strides = array<i32>} : memref<1x8x8xf32, #tpu.memory_space<vmem>>, vector<1x8x8xf32>,
    return
  }
  func.func @transform_0(%arg0: i32) -> (i32, i32, i32) {
    %c0_i32 = arith.constant 0 : i32
    %c0_i32_0 = arith.constant 0 : i32
    %c0_i32_1 = arith.constant 0 : i32
    return %arg0, %c0_i32, %c0_i32_0 : i32, i32, i32
  }
  func.func @transform_1(%arg0: i32) -> (i32, i32, i32) {
    %c0_i32 = arith.constant 0 : i32
    %c0_i32_0 = arith.constant 0 : i32
    %c0_i32_1 = arith.constant 0 : i32
    return %arg0, %c0_i32, %c0_i32_0 : i32, i32, i32
  }
  func.func @transform_2(%arg0: i32) -> (i32, i32, i32) {
    %c0_i32 = arith.constant 0 : i32
    %c0_i32_0 = arith.constant 0 : i32
    %c0_i32_1 = arith.constant 0 : i32
    return %arg0, %c0_i32, %c0_i32_0 : i32, i32, i32
  }
  func.func @transform_3(%arg0: i32) -> (i32, i32, i32) {
    %c0_i32 = arith.constant 0 : i32
    %c0_i32_0 = arith.constant 0 : i32
    %c0_i32_1 = arith.constant 0 : i32
    return %arg0, %c0_i32, %c0_i32_0 : i32, i32, i32
  }
  func.func @transform_4(%arg0: i32) -> (i32, i32, i32) {
    %c0_i32 = arith.constant 0 : i32
    %c0_i32_0 = arith.constant 0 : i32
    %c0_i32_1 = arith.constant 0 : i32
    return %arg0, %c0_i32, %c0_i32_0 : i32, i32, i32
  }
}

</mosaic_0001>

<bundles_post_ra>
// kernel: tpu_custom_call.1
= control target key start
LH: loop header
LB: loop body
LE: loop exit
PB: predicated region body
PF: predicated region fallthrough
CT: control target
= control target key end

     0   :  { %9 = vsyncpa [#allocation3], 0  ;;  %s783_s0 = inlined_call_operand.vmem [shape: bf16[2,8,32], index: 0, kind: input, shape index: {}]   ;;  %s784_s1 = inlined_call_operand.vmem [shape: bf16[2,32,8], index: 1, kind: input, shape index: {}]   ;;  %s785_s2 = inlined_call_operand.vmem [shape: f32[2,8,8], index: 2, kind: input, shape index: {}]   ;;  %s786_s3 = inlined_call_operand.vmem [shape: f32[2,8,8], index: 3, kind: input, shape index: {}]   ;;  %s787_s4 = inlined_call_operand.hbm [shape: f32[2,8,8], index: 4, kind: output, shape index: {}]  }
   0x1   :  { %11 = vsyncpa [#allocation3 + $0x1], 0  ;;  %s666_s15 = smov 0   ;;  %s668_s16 = smov 0  }
   0x2   :  { %s670_s17 = smov 0   ;;  %s672_s18 = smov 0  }
   0x3 LB: > { %s687_s19 = sadd.s32 4294967295, %s636_s18   ;;  %s489_s20 = sadd.s32 4294967294, %s636_s18   ;;  %s636_s18 = sphi %s672_s18, %s793_s18   ;;  %s632_s17 = sphi %s670_s17, %s792_s17   ;;  %s628_s16 = sphi %s668_s16, %s791_s16   ;;  %s624_s15 = sphi %s666_s15, %s790_s15  }
   0x4   : > { %s691_s21 = sadd.s32 1, %s636_s18   ;;  %s128_s22 = sadd.s32 1, %s632_s17 }
   0x5   : > { %s125_s23 = ssub.s32 %s636_s18, %s691_s21  ;;  %p138_p0 = scmp.ne.s32.totalorder %s632_s17, %s628_s16 }
   0x6   : > { %p126_p1 = scmp.eq.s32.totalorder %s125_s23, 0  ;;  %p139_p2 = scmp.eq.s32.totalorder %s687_s19, 1 }
   0x7   : > { %p144_p3 = scmp.ne.s32.totalorder %s628_s16, %s624_s15  ;;  %p145_p4 = scmp.eq.s32.totalorder %s489_s20, 1 }
   0x8   : > { %s702_s24 = scalar_select %p126_p1, %s632_s17, %s128_s22  }
   0x9   : > { %p704_p5 = por %p139_p2, %p138_p0  ;;  %p708_p6 = por %p145_p4, %p144_p3 }
   0xa   : > { %p492_p7 = scmp.ge.s32.totalorder %s636_s18, 1  ;;  %p192_p8 = scmp.lt.s32.totalorder %s636_s18, 3 }
   0xc   : > { %p193_p9 = pnand %p492_p7, %p192_p8 }
   0xd   : > { %p230_p10 = scmp.lt.s32.totalorder (!%p193_p9), %s687_s19, 1  ;;  %s227_s23 = sand.u32 (!%p193_p9), 1, %s628_s16  }
   0xe   : > { %196 = sbr.rel (%p193_p9) target bundleno = 752 (0x2f0), region = 36  ;;  %s381_s8 = scalar_lea.sflag (!%p193_p9), [#allocation3], %s227_s23 }
  0x13   : > { %v638_v0 = vmov 0.0   ;;  %vm639_vm0 = vmmov 0   ;;  %s716_s27 = scalar_select %p230_p10, %s687_s19, 1  ;;  %vm265_vm1 = vcmask 261120   ;;  %vm313_vm2 = vcmask 64512  }
  0x14   : > { %513 = vmatprep.subr.bf16.mxu0 %v638_v0  ;;  %517 = vmatprep.mubr.msk.bf16.mxu0 %vm639_vm0, %v638_v0  ;;  %vm335_vm3 = vcmask 1043456  }
  0x15   : > { %521 = vmatprep.subr.bf16.mxu1 %v638_v0  ;;  %523 = vmatprep.mubr.msk.bf16.mxu1 %vm639_vm0, %v638_v0  ;;  %s507_s28 = sshll.u32 %s716_s27, 4  ;;  %s494_s6 = sshll.u32 %s716_s27, 2 }
  0x16   : > { %s238_s5 = scalar_lea.vmem %s784_s1, %s507_s28  ;;  %s233_s9 = scalar_lea.vmem %s783_s0, %s494_s6 }
  0x17   : > { %v568_v1 = vld [vmem:[%s238_s5 + $0x8] sm:$0xff]   ;;  %v569_v2 = vld [vmem:[%s238_s5] sm:$0xff]   ;;  %s497_s10 = sshll.u32 %s716_s27, 3  ;;  %s493_s27 = sshll.u32 %s227_s23, 3 }
  0x18   : > { %514 = vmatpush3.bf16.msra.mxu0 %v568_v1  ;;  %v248_v3 = vld [vmem:[%s233_s9] sm:$0xf]  ;;  %s242_s13 = scalar_lea.vmem %s785_s2, %s497_s10  ;;  %s246_s22 = scalar_lea.vmem %s786_s3, %s497_s10 }
  0x19   : > { %515 = vmatprep.subr.bf16.mxu0 %v638_v0  ;;  %v309_v4 = vld [vmem:[%s242_s13] sm:$0xff]  ;;  %s504_s28 = sshll.u32 %s687_s19, 7  ;;  %s229_s29 = scalar_lea.vmem [#allocation2], %s493_s27 }
  0x1a   : > { %570 = vrcp.f32 %v309_v4  ;;  %v331_v17 = vpack.c.bf16 %v309_v4, %v309_v4  ;;  %v326_v20 = vld [vmem:[%s246_s22] sm:$0xff]  ;;  %s394_s30 = sshll.u32 %s229_s29, 4  ;;  %s741_s7 = scalar_lea.hbm %s787_s4, %s504_s28  ;;  %s743_s30 = int_to_ptr.vmem [resolvable:$true] %s394_s30 }
  0x1b   : > { %vm327_vm4 = vcmp.ge.f32.partialorder %v326_v20, 0.25  ;;  %s576_s9 = scalar_lea.vmem %s743_s30, 128  ;;  %s640_s19 = smov [#allocation2]  }
  0x1c   : > { %516 = vmatpush3.bf16.msra.mxu0 %v569_v2  ;;  %v337_v18 = vsel %vm335_vm3, %v331_v17, 0  ;;  %p577_p11 = scmp.ne.s32.totalorder %s743_s30, %s576_s9  ;;  %s580_s10 = sshll.u32 %s640_s19, 4  ;;  %s581_s10 = int_to_ptr.vmem [resolvable:$false] %s580_s10 }
  0x1d   : > { %522 = vmatpush3.bf16.msra.mxu1 %v337_v18  ;;  %s582_s11 = scalar_lea.vmem %s581_s10, 256  ;;  %p583_p0 = scmp.lt.s32.totalorder %s743_s30, %s581_s10 }
  0x1e   : > { %p578_p12 = pnand %p577_p11, %p704_p5  ;;  %p584_p1 = scmp.lt.s32.totalorder %s582_s11, %s576_s9 }
  0x1f   : > { %518 = vmatmul.mubr.msk.bf16.vlgmr.msra.gmra.mxu0 %vm265_vm1, %v248_v3 }
  0x20   : > { %p579_p13 = pneg %p578_p12  ;;  %p585_p2 = por %p584_p1, %p583_p0 }
  0x22   : > { %p586_p3 = pnand %p585_p2, %p579_p13 }
  0x27   : > { %v571_v5 = vpop.eup %570 }
  0xdf   : > { %v303_v6 = vpop.f32.mrf.mxu0 }
  0xe0   : > { %v312_v7 = vmul.f32 %v571_v5, %v303_v6 }
  0xe1   : > { %v519_v8 = vpop.f32.mrf.mxu0 }
  0xe2   : > { %v314_v9 = vsel %vm313_vm2, %v312_v7, -inf }
  0xe3   : > { %315 = vmax.xlane.f32.xlu0 %v314_v9  ;;  %v306_v10 = vpop.f32.mrf.mxu0 }
  0xe5   : > { %v520_v11 = vpop.f32.mrf.mxu0 }
 0x16c   : > { %v316_v12 = vpop.xlane.xlu0 %315 }
 0x16d   : > { %v317_v13 = vsub.f32 %v312_v7, %v316_v12 }
 0x16f   : > { %v318_v14 = vmul.f32 1.442695, %v317_v13 }
 0x171   : > { %572 = vpow2.f32 %v318_v14 }
 0x17e   : > { %v573_v15 = vpop.eup %572 }
 0x17f   : > { %v320_v16 = vsel %vm313_vm2, %v573_v15, 0.0 }
 0x180   : > { %321 = vadd.xlane.f32.xlu0 %v320_v16 }
 0x209   : > { %v322_v19 = vpop.xlane.xlu0 %321 }
 0x20a   : > { %574 = vrcp.f32 %v322_v19 }
 0x217   : > { %v575_v21 = vpop.eup %574 }
 0x218   : > { %v325_v22 = vmul.f32 %v575_v21, %v573_v15 }
 0x21a   : > { %v328_v23 = vmul.f32 1.3333334, %v325_v22 }
 0x21c   : > { %v329_v24 = vsel %vm327_vm4, %v328_v23, 0.0 }
 0x21d   : > { %v330_v25 = vpack.c.bf16 %v329_v24, %v329_v24 }
 0x21f   : > { %524 = vmatmul.mubr.msk.bf16.vlgmr.msra.gmra.mxu1 %vm313_vm2, %v330_v25 }
 0x2df   : > { %v373_v26 = vpop.f32.mrf.mxu1 }
 0x2e0   : > { %379 = vst.msk [vmem:[%s229_s29] sm:$0xff] %vm313_vm2, %v373_v26 }
 0x2e1   : > { %v525_v27 = vpop.f32.mrf.mxu1 }
 0x2e2   : > { %589 = shalt.err (!%p586_p3)
}
 0x2e3   : > { %s590_s12 = scalar_lea.hbm %s741_s7, 128  ;;  %s594_s20 = scalar_lea.hbm %s787_s4, 256 }
 0x2e4   : > { %p591_p4 = scmp.ne.s32.totalorder %s741_s7, %s590_s12  ;;  %p595_p9 = scmp.lt.s32.totalorder %s741_s7, %s787_s4 }
 0x2e5   : > { %p596_p10 = scmp.lt.s32.totalorder %s594_s20, %s590_s12 }
 0x2e6   : > { %p592_p7 = pnand %p591_p4, %p704_p5 }
 0x2e7   : > { %p597_p11 = por %p596_p10, %p595_p9 }
 0x2e8   : > { %p593_p8 = pneg %p592_p7 }
 0x2ea   : > { %p598_p12 = pnand %p597_p11, %p593_p8 }
 0x2ec   : > { %601 = shalt.err (!%p598_p12)
}
 0x2ed   : > { %527 = dma.vmem_to_hbm [thread:$0]  (%p704_p5), %s743_s30, 128, %s741_s7, %s381_s8   ;;  %v376_v28 = vpop.f32.mrf.mxu1 }
 0x2ef   : > { %v526_v29 = vpop.f32.mrf.mxu1 }
 0x2f0 PF: > { %p533_p13 = scmp.ge.s32.totalorder %s636_s18, 2  ;;  %s406_s27 = sand.u32 1, %s624_s15  }
 0x2f1   : > { %s407_s28 = scalar_lea.sflag [#allocation3], %s406_s27 }
 0x2f2   : > { %p530_p0 = pnand %p533_p13, %p708_p6 }
 0x2f4   : > { %p531_p1 = pneg %p530_p0 }
 0x2f6   : > { %619 = dma.done.wait (%p531_p1), %s407_s28, 128  }
 0x2f7   : > { %621 = vsyncadd (%p531_p1), %s407_s28, 4294967168  ;;  %p14_p5 = scmp.ge.s32.totalorder %s691_s21, 4   ;;  %s790_s15 = smov %s628_s16 }
 0x2f8   : > { %s791_s16 = smov %s632_s17  ;;  %s792_s17 = smov %s702_s24 }
 0x2f9   : > { %s793_s18 = smov %s691_s21  ;;  %16 = sbr.rel (!%p14_p5) target bundleno = 3 (0x3), region = 80 }
 0x2fe   :  { %412 = vsyncpa [#allocation3], 1 }
 0x2ff   :  { %414 = vsyncpa [#allocation3 + $0x1], 1 }

</bundles_post_ra>
